<compile_context>
chip_gen: v7x
topology: tpu7x:2x2x1
jax: 0.10.0
libtpu: 0.0.40
codegen_flags: <defaults>
</compile_context>

<pallas_src>
import functools

import numpy as np
import jax
import jax.numpy as jnp
from jax.experimental import pallas as pl
from jax.experimental.pallas import tpu as pltpu


def graclus_pool_kernel(idx_ref, x_ref, o_ref, *, n_out, unroll):
    """One graph per grid step.

    idx_ref : (L,) int32 in SMEM     graclus permutation (scalar prefetch)
    x_ref   : (1, N, C+1) f32        node features with s_batch appended as the
                                     last channel
    o_ref   : (1, n_out, C+1) f32    pair-max-pooled permuted rows
    """

    def body(j, carry):
        i0 = idx_ref[2 * j]
        i1 = idx_ref[2 * j + 1]
        r0 = x_ref[0, pl.ds(i0, 1), :]          # (1, C+1) gathered row
        r1 = x_ref[0, pl.ds(i1, 1), :]          # (1, C+1) its matched partner
        o_ref[0, pl.ds(j, 1), :] = jnp.maximum(r0, r1)
        return carry

    jax.lax.fori_loop(0, n_out, body, 0, unroll=unroll)


def graclus_pooling_permutation(x_s, s_batch, edge_index_s1, edge_weight_s1,
                                idx_dic1, *, num_graphs):
    """Mirrors Graclus_Pooling_Permutation.forward.

    x_s            : (num_graphs * N, C) float32 node features
    s_batch        : (num_graphs * N,)   per-node integer labels
    edge_index_s1  : (2, E) int32 pooled-graph edges (shared by all graphs)
    edge_weight_s1 : (E,) float32
    idx_dic1       : (L,) int32 permutation of node indices (pairs adjacent)

    Returns ((new_x_s, new_edge_index, new_edge_weight), pooled_s_batch).
    """
    total_nodes, C = x_s.shape
    N = total_nodes // num_graphs
    idx = idx_dic1.astype(jnp.int32)
    L = idx.shape[0]
    n_out = L // 2                      # MaxPool1d(2, stride=2) output length
    Ca = C + 1

    # Fuse s_batch in as the last feature channel: one gather+max pass covers
    # both the feature pooling and the batch-vector pooling.
    x_g = x_s.reshape(num_graphs, N, C).astype(jnp.float32)
    s_g = s_batch.reshape(num_graphs, N, 1).astype(jnp.float32)
    x_aug = jnp.concatenate([x_g, s_g], axis=-1)            # (G, N, C+1)

    kernel = functools.partial(graclus_pool_kernel, n_out=n_out,
                               unroll=max(1, min(8, n_out)))

    out = pl.pallas_call(
        kernel,
        out_shape=jax.ShapeDtypeStruct((num_graphs, n_out, Ca), jnp.float32),
        grid_spec=pltpu.PrefetchScalarGridSpec(
            num_scalar_prefetch=1,                  # idx_dic1 -> SMEM
            grid=(num_graphs,),
            in_specs=[
                pl.BlockSpec((1, N, Ca), lambda g, idx_ref: (g, 0, 0)),
            ],
            out_specs=pl.BlockSpec((1, n_out, Ca), lambda g, idx_ref: (g, 0, 0)),
        ),
        compiler_params=pltpu.CompilerParams(
            dimension_semantics=("parallel",)),
    )(idx, x_aug)

    new_x_s = out[..., :C].reshape(num_graphs * n_out, C)
    pooled_s = out[..., C].reshape(-1).astype(jnp.int32)     # exact int values

    # Batch.from_data_list bookkeeping (plain-JAX glue): every graph reuses the
    # same pooled-graph edges; node ids are offset by each graph's node count.
    E = edge_index_s1.shape[1]
    offsets = jnp.arange(num_graphs, dtype=edge_index_s1.dtype) * n_out
    new_edge_index = jnp.transpose(
        edge_index_s1[None, :, :] + offsets[:, None, None],
        (1, 0, 2)).reshape(2, num_graphs * E)
    new_edge_weight = jnp.tile(edge_weight_s1, num_graphs)

    return (new_x_s, new_edge_index, new_edge_weight), pooled_s


def reference_forward(x_s, s_batch, edge_index_s1, edge_weight_s1, idx_dic1,
                      *, num_graphs):
    """Pure-JAX mirror of the PyTorch forward (for checking)."""
    C = x_s.shape[-1]
    N = x_s.shape[0] // num_graphs
    n_out = idx_dic1.shape[0] // 2
    idx = idx_dic1[:2 * n_out]

    x = x_s.reshape(num_graphs, N, C)[:, idx, :]
    x = x.reshape(num_graphs, n_out, 2, C).max(axis=2)
    s = s_batch.astype(jnp.float32).reshape(num_graphs, N)[:, idx]
    s = s.reshape(num_graphs, n_out, 2).max(axis=2)

    E = edge_index_s1.shape[1]
    offsets = jnp.arange(num_graphs, dtype=edge_index_s1.dtype) * n_out
    ei = jnp.transpose(edge_index_s1[None, :, :] + offsets[:, None, None],
                       (1, 0, 2)).reshape(2, num_graphs * E)
    ew = jnp.tile(edge_weight_s1, num_graphs)
    return (x.reshape(num_graphs * n_out, C), ei, ew), s.reshape(-1).astype(jnp.int32)


if __name__ == "__main__":
    key = jax.random.PRNGKey(0)
    num_graphs, N, C, E = 2, 16, 8, 20
    ks = jax.random.split(key, 5)

    x_s = jax.random.normal(ks[0], (num_graphs * N, C), jnp.float32)
    s_batch = jax.random.randint(ks[1], (num_graphs * N,), 0, 7).astype(jnp.int32)
    idx_dic1 = jax.random.permutation(ks[2], N).astype(jnp.int32)
    edge_index_s1 = jax.random.randint(ks[3], (2, E), 0, N // 2).astype(jnp.int32)
    edge_weight_s1 = jax.random.uniform(ks[4], (E,), jnp.float32)

    (x_out, ei_out, ew_out), s_out = graclus_pooling_permutation(
        x_s, s_batch, edge_index_s1, edge_weight_s1, idx_dic1,
        num_graphs=num_graphs)
    x_out = jax.block_until_ready(x_out)
    s_out = jax.block_until_ready(s_out)

    n_out = idx_dic1.shape[0] // 2
    assert x_out.shape == (num_graphs * n_out, C), x_out.shape
    assert s_out.shape == (num_graphs * n_out,), s_out.shape

    (x_ref, ei_ref, ew_ref), s_ref = reference_forward(
        x_s, s_batch, edge_index_s1, edge_weight_s1, idx_dic1,
        num_graphs=num_graphs)

    # Permutation + max is exact: demand bit-for-bit agreement.
    np.testing.assert_allclose(np.asarray(x_out), np.asarray(x_ref),
                               rtol=0.0, atol=0.0)
    np.testing.assert_array_equal(np.asarray(s_out), np.asarray(s_ref))
    np.testing.assert_array_equal(np.asarray(ei_out), np.asarray(ei_ref))
    np.testing.assert_allclose(np.asarray(ew_out), np.asarray(ew_ref),
                               rtol=0.0, atol=0.0)

    print("KERNEL_OK")
</pallas_src>

<mosaic_0001>
module attributes {stable_mosaic.version = 11 : i64} {
  func.func @graclus_pool_kernel(%arg0: i32, %arg1: memref<16xi32, #tpu.memory_space<smem>>, %arg2: memref<1x16x9xf32, #tpu.memory_space<vmem>>, %arg3: memref<1x8x9xf32, #tpu.memory_space<vmem>>) attributes {dimension_semantics = [#tpu.dimension_semantics<parallel>], iteration_bounds = array<i64: 2>, scalar_prefetch = 1 : i64, scratch_operands = 0 : i64, tpu.core_type = #tpu.core_type<tc>, window_params = [{transform_indices = @transform_0, window_bounds = array<i64: 1, 16, 9>}, {transform_indices = @transform_1, window_bounds = array<i64: 1, 8, 9>}]} {
    %c0_i32 = arith.constant 0 : i32
    %c2_i32 = arith.constant 2 : i32
    %0 = arith.muli %c2_i32, %c0_i32 : i32
    %1 = arith.index_cast %0 : i32 to index
    %2 = memref.load %arg1[%1] : memref<16xi32, #tpu.memory_space<smem>>
    %c2_i32_0 = arith.constant 2 : i32
    %3 = arith.muli %c2_i32_0, %c0_i32 : i32
    %c1_i32 = arith.constant 1 : i32
    %4 = arith.addi %3, %c1_i32 : i32
    %5 = arith.index_cast %4 : i32 to index
    %6 = memref.load %arg1[%5] : memref<16xi32, #tpu.memory_space<smem>>
    %c0 = arith.constant 0 : index
    %7 = arith.index_cast %2 : i32 to index
    %c0_1 = arith.constant 0 : index
    %8 = vector.load %arg2[%c0, %7, %c0_1] : memref<1x16x9xf32, #tpu.memory_space<vmem>>, vector<1x1x9xf32>
    %9 = vector.shape_cast %8 : vector<1x1x9xf32> to vector<1x9xf32>
    %c0_2 = arith.constant 0 : index
    %10 = arith.index_cast %6 : i32 to index
    %c0_3 = arith.constant 0 : index
    %11 = vector.load %arg2[%c0_2, %10, %c0_3] : memref<1x16x9xf32, #tpu.memory_space<vmem>>, vector<1x1x9xf32>
    %12 = vector.shape_cast %11 : vector<1x1x9xf32> to vector<1x9xf32>
    %13 = arith.maximumf %9, %12 : vector<1x9xf32>
    %c0_4 = arith.constant 0 : index
    %14 = arith.index_cast %c0_i32 : i32 to index
    %c0_5 = arith.constant 0 : index
    %15 = vector.load %arg3[%c0_4, %14, %c0_5] : memref<1x8x9xf32, #tpu.memory_space<vmem>>, vector<1x1x9xf32>
    %16 = vector.shape_cast %15 : vector<1x1x9xf32> to vector<1x9xf32>
    %17 = vector.shape_cast %13 : vector<1x9xf32> to vector<1x1x9xf32>
    tpu.vector_store %arg3[%c0_4, %14, %c0_5], %17 {strides = array<i32>} : memref<1x8x9xf32, #tpu.memory_space<vmem>>, vector<1x1x9xf32>,
    %c1_i32_6 = arith.constant 1 : i32
    %c2_i32_7 = arith.constant 2 : i32
    %18 = arith.muli %c2_i32_7, %c1_i32_6 : i32
    %19 = arith.index_cast %18 : i32 to index
    %20 = memref.load %arg1[%19] : memref<16xi32, #tpu.memory_space<smem>>
    %c2_i32_8 = arith.constant 2 : i32
    %21 = arith.muli %c2_i32_8, %c1_i32_6 : i32
    %c1_i32_9 = arith.constant 1 : i32
    %22 = arith.addi %21, %c1_i32_9 : i32
    %23 = arith.index_cast %22 : i32 to index
    %24 = memref.load %arg1[%23] : memref<16xi32, #tpu.memory_space<smem>>
    %c0_10 = arith.constant 0 : index
    %25 = arith.index_cast %20 : i32 to index
    %c0_11 = arith.constant 0 : index
    %26 = vector.load %arg2[%c0_10, %25, %c0_11] : memref<1x16x9xf32, #tpu.memory_space<vmem>>, vector<1x1x9xf32>
    %27 = vector.shape_cast %26 : vector<1x1x9xf32> to vector<1x9xf32>
    %c0_12 = arith.constant 0 : index
    %28 = arith.index_cast %24 : i32 to index
    %c0_13 = arith.constant 0 : index
    %29 = vector.load %arg2[%c0_12, %28, %c0_13] : memref<1x16x9xf32, #tpu.memory_space<vmem>>, vector<1x1x9xf32>
    %30 = vector.shape_cast %29 : vector<1x1x9xf32> to vector<1x9xf32>
    %31 = arith.maximumf %27, %30 : vector<1x9xf32>
    %c0_14 = arith.constant 0 : index
    %32 = arith.index_cast %c1_i32_6 : i32 to index
    %c0_15 = arith.constant 0 : index
    %33 = vector.load %arg3[%c0_14, %32, %c0_15] : memref<1x8x9xf32, #tpu.memory_space<vmem>>, vector<1x1x9xf32>
    %34 = vector.shape_cast %33 : vector<1x1x9xf32> to vector<1x9xf32>
    %35 = vector.shape_cast %31 : vector<1x9xf32> to vector<1x1x9xf32>
    tpu.vector_store %arg3[%c0_14, %32, %c0_15], %35 {strides = array<i32>} : memref<1x8x9xf32, #tpu.memory_space<vmem>>, vector<1x1x9xf32>,
    %c2_i32_16 = arith.constant 2 : i32
    %c2_i32_17 = arith.constant 2 : i32
    %36 = arith.muli %c2_i32_17, %c2_i32_16 : i32
    %37 = arith.index_cast %36 : i32 to index
    %38 = memref.load %arg1[%37] : memref<16xi32, #tpu.memory_space<smem>>
    %c2_i32_18 = arith.constant 2 : i32
    %39 = arith.muli %c2_i32_18, %c2_i32_16 : i32
    %c1_i32_19 = arith.constant 1 : i32
    %40 = arith.addi %39, %c1_i32_19 : i32
    %41 = arith.index_cast %40 : i32 to index
    %42 = memref.load %arg1[%41] : memref<16xi32, #tpu.memory_space<smem>>
    %c0_20 = arith.constant 0 : index
    %43 = arith.index_cast %38 : i32 to index
    %c0_21 = arith.constant 0 : index
    %44 = vector.load %arg2[%c0_20, %43, %c0_21] : memref<1x16x9xf32, #tpu.memory_space<vmem>>, vector<1x1x9xf32>
    %45 = vector.shape_cast %44 : vector<1x1x9xf32> to vector<1x9xf32>
    %c0_22 = arith.constant 0 : index
    %46 = arith.index_cast %42 : i32 to index
    %c0_23 = arith.constant 0 : index
    %47 = vector.load %arg2[%c0_22, %46, %c0_23] : memref<1x16x9xf32, #tpu.memory_space<vmem>>, vector<1x1x9xf32>
    %48 = vector.shape_cast %47 : vector<1x1x9xf32> to vector<1x9xf32>
    %49 = arith.maximumf %45, %48 : vector<1x9xf32>
    %c0_24 = arith.constant 0 : index
    %50 = arith.index_cast %c2_i32_16 : i32 to index
    %c0_25 = arith.constant 0 : index
    %51 = vector.load %arg3[%c0_24, %50, %c0_25] : memref<1x8x9xf32, #tpu.memory_space<vmem>>, vector<1x1x9xf32>
    %52 = vector.shape_cast %51 : vector<1x1x9xf32> to vector<1x9xf32>
    %53 = vector.shape_cast %49 : vector<1x9xf32> to vector<1x1x9xf32>
    tpu.vector_store %arg3[%c0_24, %50, %c0_25], %53 {strides = array<i32>} : memref<1x8x9xf32, #tpu.memory_space<vmem>>, vector<1x1x9xf32>,
    %c3_i32 = arith.constant 3 : i32
    %c2_i32_26 = arith.constant 2 : i32
    %54 = arith.muli %c2_i32_26, %c3_i32 : i32
    %55 = arith.index_cast %54 : i32 to index
    %56 = memref.load %arg1[%55] : memref<16xi32, #tpu.memory_space<smem>>
    %c2_i32_27 = arith.constant 2 : i32
    %57 = arith.muli %c2_i32_27, %c3_i32 : i32
    %c1_i32_28 = arith.constant 1 : i32
    %58 = arith.addi %57, %c1_i32_28 : i32
    %59 = arith.index_cast %58 : i32 to index
    %60 = memref.load %arg1[%59] : memref<16xi32, #tpu.memory_space<smem>>
    %c0_29 = arith.constant 0 : index
    %61 = arith.index_cast %56 : i32 to index
    %c0_30 = arith.constant 0 : index
    %62 = vector.load %arg2[%c0_29, %61, %c0_30] : memref<1x16x9xf32, #tpu.memory_space<vmem>>, vector<1x1x9xf32>
    %63 = vector.shape_cast %62 : vector<1x1x9xf32> to vector<1x9xf32>
    %c0_31 = arith.constant 0 : index
    %64 = arith.index_cast %60 : i32 to index
    %c0_32 = arith.constant 0 : index
    %65 = vector.load %arg2[%c0_31, %64, %c0_32] : memref<1x16x9xf32, #tpu.memory_space<vmem>>, vector<1x1x9xf32>
    %66 = vector.shape_cast %65 : vector<1x1x9xf32> to vector<1x9xf32>
    %67 = arith.maximumf %63, %66 : vector<1x9xf32>
    %c0_33 = arith.constant 0 : index
    %68 = arith.index_cast %c3_i32 : i32 to index
    %c0_34 = arith.constant 0 : index
    %69 = vector.load %arg3[%c0_33, %68, %c0_34] : memref<1x8x9xf32, #tpu.memory_space<vmem>>, vector<1x1x9xf32>
    %70 = vector.shape_cast %69 : vector<1x1x9xf32> to vector<1x9xf32>
    %71 = vector.shape_cast %67 : vector<1x9xf32> to vector<1x1x9xf32>
    tpu.vector_store %arg3[%c0_33, %68, %c0_34], %71 {strides = array<i32>} : memref<1x8x9xf32, #tpu.memory_space<vmem>>, vector<1x1x9xf32>,
    %c4_i32 = arith.constant 4 : i32
    %c2_i32_35 = arith.constant 2 : i32
    %72 = arith.muli %c2_i32_35, %c4_i32 : i32
    %73 = arith.index_cast %72 : i32 to index
    %74 = memref.load %arg1[%73] : memref<16xi32, #tpu.memory_space<smem>>
    %c2_i32_36 = arith.constant 2 : i32
    %75 = arith.muli %c2_i32_36, %c4_i32 : i32
    %c1_i32_37 = arith.constant 1 : i32
    %76 = arith.addi %75, %c1_i32_37 : i32
    %77 = arith.index_cast %76 : i32 to index
    %78 = memref.load %arg1[%77] : memref<16xi32, #tpu.memory_space<smem>>
    %c0_38 = arith.constant 0 : index
    %79 = arith.index_cast %74 : i32 to index
    %c0_39 = arith.constant 0 : index
    %80 = vector.load %arg2[%c0_38, %79, %c0_39] : memref<1x16x9xf32, #tpu.memory_space<vmem>>, vector<1x1x9xf32>
    %81 = vector.shape_cast %80 : vector<1x1x9xf32> to vector<1x9xf32>
    %c0_40 = arith.constant 0 : index
    %82 = arith.index_cast %78 : i32 to index
    %c0_41 = arith.constant 0 : index
    %83 = vector.load %arg2[%c0_40, %82, %c0_41] : memref<1x16x9xf32, #tpu.memory_space<vmem>>, vector<1x1x9xf32>
    %84 = vector.shape_cast %83 : vector<1x1x9xf32> to vector<1x9xf32>
    %85 = arith.maximumf %81, %84 : vector<1x9xf32>
    %c0_42 = arith.constant 0 : index
    %86 = arith.index_cast %c4_i32 : i32 to index
    %c0_43 = arith.constant 0 : index
    %87 = vector.load %arg3[%c0_42, %86, %c0_43] : memref<1x8x9xf32, #tpu.memory_space<vmem>>, vector<1x1x9xf32>
    %88 = vector.shape_cast %87 : vector<1x1x9xf32> to vector<1x9xf32>
    %89 = vector.shape_cast %85 : vector<1x9xf32> to vector<1x1x9xf32>
    tpu.vector_store %arg3[%c0_42, %86, %c0_43], %89 {strides = array<i32>} : memref<1x8x9xf32, #tpu.memory_space<vmem>>, vector<1x1x9xf32>,
    %c5_i32 = arith.constant 5 : i32
    %c2_i32_44 = arith.constant 2 : i32
    %90 = arith.muli %c2_i32_44, %c5_i32 : i32
    %91 = arith.index_cast %90 : i32 to index
    %92 = memref.load %arg1[%91] : memref<16xi32, #tpu.memory_space<smem>>
    %c2_i32_45 = arith.constant 2 : i32
    %93 = arith.muli %c2_i32_45, %c5_i32 : i32
    %c1_i32_46 = arith.constant 1 : i32
    %94 = arith.addi %93, %c1_i32_46 : i32
    %95 = arith.index_cast %94 : i32 to index
    %96 = memref.load %arg1[%95] : memref<16xi32, #tpu.memory_space<smem>>
    %c0_47 = arith.constant 0 : index
    %97 = arith.index_cast %92 : i32 to index
    %c0_48 = arith.constant 0 : index
    %98 = vector.load %arg2[%c0_47, %97, %c0_48] : memref<1x16x9xf32, #tpu.memory_space<vmem>>, vector<1x1x9xf32>
    %99 = vector.shape_cast %98 : vector<1x1x9xf32> to vector<1x9xf32>
    %c0_49 = arith.constant 0 : index
    %100 = arith.index_cast %96 : i32 to index
    %c0_50 = arith.constant 0 : index
    %101 = vector.load %arg2[%c0_49, %100, %c0_50] : memref<1x16x9xf32, #tpu.memory_space<vmem>>, vector<1x1x9xf32>
    %102 = vector.shape_cast %101 : vector<1x1x9xf32> to vector<1x9xf32>
    %103 = arith.maximumf %99, %102 : vector<1x9xf32>
    %c0_51 = arith.constant 0 : index
    %104 = arith.index_cast %c5_i32 : i32 to index
    %c0_52 = arith.constant 0 : index
    %105 = vector.load %arg3[%c0_51, %104, %c0_52] : memref<1x8x9xf32, #tpu.memory_space<vmem>>, vector<1x1x9xf32>
    %106 = vector.shape_cast %105 : vector<1x1x9xf32> to vector<1x9xf32>
    %107 = vector.shape_cast %103 : vector<1x9xf32> to vector<1x1x9xf32>
    tpu.vector_store %arg3[%c0_51, %104, %c0_52], %107 {strides = array<i32>} : memref<1x8x9xf32, #tpu.memory_space<vmem>>, vector<1x1x9xf32>,
    %c6_i32 = arith.constant 6 : i32
    %c2_i32_53 = arith.constant 2 : i32
    %108 = arith.muli %c2_i32_53, %c6_i32 : i32
    %109 = arith.index_cast %108 : i32 to index
    %110 = memref.load %arg1[%109] : memref<16xi32, #tpu.memory_space<smem>>
    %c2_i32_54 = arith.constant 2 : i32
    %111 = arith.muli %c2_i32_54, %c6_i32 : i32
    %c1_i32_55 = arith.constant 1 : i32
    %112 = arith.addi %111, %c1_i32_55 : i32
    %113 = arith.index_cast %112 : i32 to index
    %114 = memref.load %arg1[%113] : memref<16xi32, #tpu.memory_space<smem>>
    %c0_56 = arith.constant 0 : index
    %115 = arith.index_cast %110 : i32 to index
    %c0_57 = arith.constant 0 : index
    %116 = vector.load %arg2[%c0_56, %115, %c0_57] : memref<1x16x9xf32, #tpu.memory_space<vmem>>, vector<1x1x9xf32>
    %117 = vector.shape_cast %116 : vector<1x1x9xf32> to vector<1x9xf32>
    %c0_58 = arith.constant 0 : index
    %118 = arith.index_cast %114 : i32 to index
    %c0_59 = arith.constant 0 : index
    %119 = vector.load %arg2[%c0_58, %118, %c0_59] : memref<1x16x9xf32, #tpu.memory_space<vmem>>, vector<1x1x9xf32>
    %120 = vector.shape_cast %119 : vector<1x1x9xf32> to vector<1x9xf32>
    %121 = arith.maximumf %117, %120 : vector<1x9xf32>
    %c0_60 = arith.constant 0 : index
    %122 = arith.index_cast %c6_i32 : i32 to index
    %c0_61 = arith.constant 0 : index
    %123 = vector.load %arg3[%c0_60, %122, %c0_61] : memref<1x8x9xf32, #tpu.memory_space<vmem>>, vector<1x1x9xf32>
    %124 = vector.shape_cast %123 : vector<1x1x9xf32> to vector<1x9xf32>
    %125 = vector.shape_cast %121 : vector<1x9xf32> to vector<1x1x9xf32>
    tpu.vector_store %arg3[%c0_60, %122, %c0_61], %125 {strides = array<i32>} : memref<1x8x9xf32, #tpu.memory_space<vmem>>, vector<1x1x9xf32>,
    %c7_i32 = arith.constant 7 : i32
    %c2_i32_62 = arith.constant 2 : i32
    %126 = arith.muli %c2_i32_62, %c7_i32 : i32
    %127 = arith.index_cast %126 : i32 to index
    %128 = memref.load %arg1[%127] : memref<16xi32, #tpu.memory_space<smem>>
    %c2_i32_63 = arith.constant 2 : i32
    %129 = arith.muli %c2_i32_63, %c7_i32 : i32
    %c1_i32_64 = arith.constant 1 : i32
    %130 = arith.addi %129, %c1_i32_64 : i32
    %131 = arith.index_cast %130 : i32 to index
    %132 = memref.load %arg1[%131] : memref<16xi32, #tpu.memory_space<smem>>
    %c0_65 = arith.constant 0 : index
    %133 = arith.index_cast %128 : i32 to index
    %c0_66 = arith.constant 0 : index
    %134 = vector.load %arg2[%c0_65, %133, %c0_66] : memref<1x16x9xf32, #tpu.memory_space<vmem>>, vector<1x1x9xf32>
    %135 = vector.shape_cast %134 : vector<1x1x9xf32> to vector<1x9xf32>
    %c0_67 = arith.constant 0 : index
    %136 = arith.index_cast %132 : i32 to index
    %c0_68 = arith.constant 0 : index
    %137 = vector.load %arg2[%c0_67, %136, %c0_68] : memref<1x16x9xf32, #tpu.memory_space<vmem>>, vector<1x1x9xf32>
    %138 = vector.shape_cast %137 : vector<1x1x9xf32> to vector<1x9xf32>
    %139 = arith.maximumf %135, %138 : vector<1x9xf32>
    %c0_69 = arith.constant 0 : index
    %140 = arith.index_cast %c7_i32 : i32 to index
    %c0_70 = arith.constant 0 : index
    %141 = vector.load %arg3[%c0_69, %140, %c0_70] : memref<1x8x9xf32, #tpu.memory_space<vmem>>, vector<1x1x9xf32>
    %142 = vector.shape_cast %141 : vector<1x1x9xf32> to vector<1x9xf32>
    %143 = vector.shape_cast %139 : vector<1x9xf32> to vector<1x1x9xf32>
    tpu.vector_store %arg3[%c0_69, %140, %c0_70], %143 {strides = array<i32>} : memref<1x8x9xf32, #tpu.memory_space<vmem>>, vector<1x1x9xf32>,
    %c8_i32 = arith.constant 8 : i32
    return
  }
  func.func @transform_0(%arg0: i32, %arg1: memref<16xi32, #tpu.memory_space<smem>>) -> (i32, i32, i32) {
    %c0_i32 = arith.constant 0 : i32
    %c0_i32_0 = arith.constant 0 : i32
    %c0_i32_1 = arith.constant 0 : i32
    return %arg0, %c0_i32, %c0_i32_0 : i32, i32, i32
  }
  func.func @transform_1(%arg0: i32, %arg1: memref<16xi32, #tpu.memory_space<smem>>) -> (i32, i32, i32) {
    %c0_i32 = arith.constant 0 : i32
    %c0_i32_0 = arith.constant 0 : i32
    %c0_i32_1 = arith.constant 0 : i32
    return %arg0, %c0_i32, %c0_i32_0 : i32, i32, i32
  }
}

</mosaic_0001>

<bundles_post_ra>
// kernel: tpu_custom_call.1
= control target key start
LH: loop header
LB: loop body
LE: loop exit
PB: predicated region body
PF: predicated region fallthrough
CT: control target
= control target key end

     0   :  { %s582_s0 = inlined_call_operand.vmem [shape: s32[16], index: 0, kind: input, shape index: {}]   ;;  %s583_s1 = inlined_call_operand.vmem [shape: f32[2,16,9], index: 1, kind: input, shape index: {}]   ;;  %s584_s2 = inlined_call_operand.hbm [shape: f32[2,8,9], index: 2, kind: output, shape index: {}]  }
   0x1   :  { %s7_s11 = sshll.u32 %s582_s0, 4  ;;  %s8_s11 = int_to_ptr.vmem [resolvable:$true] %s7_s11 }
   0x2   :  { %s343_s12 = scalar_lea.vmem %s8_s11, 16  ;;  %p348_p1 = scmp.lt.s32.totalorder %s8_s11, %s8_s11 }
   0x3   :  { %p344_p0 = scmp.ne.s32.totalorder %s8_s11, %s343_s12  ;;  %p349_p2 = scmp.lt.s32.totalorder %s343_s12, %s343_s12 }
   0x5   :  { %p350_p3 = por %p349_p2, %p348_p1 }
   0x7   :  { %p351_p4 = pnand %p350_p3, %p344_p0 }
   0x9   :  { %354 = shalt.err (!%p351_p4)  }
   0xa   :  { %s421_s13 = smov [#allocation3]  }
   0xb   :  { %10 = dma.vmem_to_smem %s8_s11, 16, %s421_s13, [#allocation2] }
   0xc   :  { %399 = dma.done.wait [#allocation2], 16 }
   0xd   :  { %400 = vsyncadd [#allocation2], 4294967280 }
   0xe   :  { %12 = sfence }
   0xf   :  { %13 = vsyncpa [#allocation5], 0 }
  0x10   :  { %15 = vsyncpa [#allocation5 + $0x1], 0  ;;  %s441_s14 = smov 0   ;;  %s443_s15 = smov 0  }
  0x11   :  { %s445_s0 = smov 0   ;;  %s447_s16 = smov 0  }
  0x12 LB: > { %s462_s17 = sadd.s32 4294967295, %s419_s16   ;;  %s276_s18 = sadd.s32 4294967294, %s419_s16   ;;  %s419_s16 = sphi %s447_s16, %s590_s16   ;;  %s415_s0 = sphi %s445_s0, %s589_s0   ;;  %s411_s15 = sphi %s443_s15, %s588_s15   ;;  %s407_s14 = sphi %s441_s14, %s587_s14  }
  0x13   : > { %s466_s19 = sadd.s32 1, %s419_s16   ;;  %s54_s20 = sadd.s32 1, %s415_s0 }
  0x14   : > { %s51_s21 = ssub.s32 %s419_s16, %s466_s19  ;;  %p64_p5 = scmp.ne.s32.totalorder %s415_s0, %s411_s15 }
  0x15   : > { %p52_p6 = scmp.eq.s32.totalorder %s51_s21, 0  ;;  %p65_p7 = scmp.eq.s32.totalorder %s462_s17, 1 }
  0x16   : > { %p70_p8 = scmp.ne.s32.totalorder %s411_s15, %s407_s14  ;;  %p71_p9 = scmp.eq.s32.totalorder %s276_s18, 1 }
  0x17   : > { %s477_s22 = scalar_select %p52_p6, %s415_s0, %s54_s20  }
  0x18   : > { %p479_p10 = por %p65_p7, %p64_p5  ;;  %p483_p11 = por %p71_p9, %p70_p8 }
  0x19   : > { %p279_p12 = scmp.ge.s32.totalorder %s419_s16, 1  ;;  %p97_p13 = scmp.lt.s32.totalorder %s419_s16, 3 }
  0x1b   : > { %p98_p0 = pnand %p279_p12, %p97_p13 }
  0x1c   : > { %s114_s25 = sand.u32 (!%p98_p0), 1, %s411_s15   ;;  %p117_p1 = scmp.lt.s32.totalorder (!%p98_p0), %s462_s17, 1  ;;  %vm129_vm0 = vcmask (!%p98_p0), 65536  }
  0x1d   : > { %101 = sbr.rel (%p98_p0) target bundleno = 75 (0x4b), region = 24  ;;  %s280_s26 = sshll.u32 (!%p98_p0), %s114_s25, 3 }
  0x1e   : > { %s122_s27 = sld [smem:[#allocation3]] (!%p98_p0)  ;;  %s283_s28 = sld [smem:[#allocation3 + $0x1]] (!%p98_p0) }
  0x1f   : > { %s284_s30 = sld [smem:[#allocation3 + $0x2]] (!%p98_p0)  ;;  %s285_s4 = sld [smem:[#allocation3 + $0x3]] (!%p98_p0) }
  0x20   : > { %s286_s8 = sld [smem:[#allocation3 + $0x4]] (!%p98_p0)  ;;  %s287_s10 = sld [smem:[#allocation3 + $0x5]] (!%p98_p0) }
  0x21   : > { %s288_s12 = sld [smem:[#allocation3 + $0x6]] (!%p98_p0)  ;;  %s289_s13 = sld [smem:[#allocation3 + $0x7]] (!%p98_p0) }
  0x22   : > { %s290_s18 = sld [smem:[#allocation3 + $0x8]] (!%p98_p0)  ;;  %s291_s21 = sld [smem:[#allocation3 + $0x9]] (!%p98_p0) }
  0x23   : > { %s503_s5 = scalar_lea.vmem (!%p98_p0), [#allocation4], %s280_s26  ;;  %s294_s6 = sld [smem:[#allocation3 + $0xc]] (!%p98_p0) }
  0x24   : > { %s118_s29 = scalar_select %p117_p1, %s462_s17, 1 }
  0x26   : > { %s302_s3 = sshll.u32 %s118_s29, 4 }
  0x27   : > { %s497_s7 = scalar_lea.vmem %s583_s1, %s302_s3  ;;  %s292_s3 = sld [smem:[#allocation3 + $0xa]] }
  0x28   : > { %s124_s9 = scalar_lea.vmem %s497_s7, %s122_s27  ;;  %s126_s11 = scalar_lea.vmem %s497_s7, %s283_s28 }
  0x29   : > { %v125_v0 = vld [vmem:[%s124_s9] sm:$0x1]  ;;  %s133_s20 = scalar_lea.vmem %s497_s7, %s284_s30  ;;  %s135_s29 = scalar_lea.vmem %s497_s7, %s285_s4 }
  0x2a   : > { %v127_v1 = vld [vmem:[%s126_s11] sm:$0x1]  ;;  %s141_s27 = scalar_lea.vmem %s497_s7, %s286_s8  ;;  %s293_s28 = sld [smem:[#allocation3 + $0xb]] }
  0x2b   : > { %v128_v2 = vmax.f32 %v125_v0, %v127_v1  ;;  %v134_v3 = vld [vmem:[%s133_s20] sm:$0x1]  ;;  %s143_s30 = scalar_lea.vmem %s497_s7, %s287_s10  ;;  %s149_s4 = scalar_lea.vmem %s497_s7, %s288_s12 }
  0x2c   : > { %v136_v4 = vld [vmem:[%s135_s29] sm:$0x1]  ;;  %s295_s9 = sld [smem:[#allocation3 + $0xd]]  ;;  %s151_s26 = scalar_lea.vmem %s497_s7, %s289_s13 }
  0x2d   : > { %130 = vst.msk [vmem:[%s503_s5] sm:$0x1] %vm129_vm0, %v128_v2  ;;  %v137_v5 = vmax.f32 %v134_v3, %v136_v4  ;;  %v142_v6 = vld [vmem:[%s141_s27] sm:$0x1]  ;;  %s157_s8 = scalar_lea.vmem %s497_s7, %s290_s18  ;;  %s159_s11 = scalar_lea.vmem %s497_s7, %s291_s21 }
  0x2e   : > { %v144_v7 = vld [vmem:[%s143_s30] sm:$0x1]  ;;  %s296_s10 = sld [smem:[#allocation3 + $0xe]]  ;;  %s165_s12 = scalar_lea.vmem %s497_s7, %s292_s3 }
  0x2f   : > { %138 = vst.msk [vmem:[%s503_s5 + $0x1] sm:$0x1] %vm129_vm0, %v137_v5  ;;  %v145_v8 = vmax.f32 %v142_v6, %v144_v7  ;;  %v150_v9 = vld [vmem:[%s149_s4] sm:$0x1]  ;;  %s297_s20 = sld [smem:[#allocation3 + $0xf]]  ;;  %s173_s18 = scalar_lea.vmem %s497_s7, %s294_s6 }
  0x30   : > { %v152_v10 = vld [vmem:[%s151_s26] sm:$0x1]  ;;  %s167_s13 = scalar_lea.vmem %s497_s7, %s293_s28  ;;  %s299_s29 = sshll.u32 %s462_s17, 7 }
  0x31   : > { %v158_v11 = vld [vmem:[%s157_s8] sm:$0x1]  ;;  %146 = vst.msk [vmem:[%s503_s5 + $0x2] sm:$0x1] %vm129_vm0, %v145_v8  ;;  %v153_v12 = vmax.f32 %v150_v9, %v152_v10  ;;  %s201_s27 = sshll.u32 %s503_s5, 4  ;;  %s536_s4 = scalar_lea.hbm %s584_s2, %s299_s29  ;;  %s538_s27 = int_to_ptr.vmem [resolvable:$true] %s201_s27 }
  0x32   : > { %v160_v13 = vld [vmem:[%s159_s11] sm:$0x1]  ;;  %s175_s21 = scalar_lea.vmem %s497_s7, %s295_s9  ;;  %s188_s17 = scalar_lea.sflag [#allocation5], %s114_s25 }
  0x33   : > { %v161_v14 = vmax.f32 %v158_v11, %v160_v13  ;;  %v166_v15 = vld [vmem:[%s165_s12] sm:$0x1]  ;;  %154 = vst.msk [vmem:[%s503_s5 + $0x3] sm:$0x1] %vm129_vm0, %v153_v12  ;;  %s355_s9 = scalar_lea.vmem %s538_s27, 128 }
  0x34   : > { %v168_v16 = vld [vmem:[%s167_s13] sm:$0x1]  ;;  %s181_s3 = scalar_lea.vmem %s497_s7, %s296_s10  ;;  %p356_p2 = scmp.ne.s32.totalorder %s538_s27, %s355_s9 }
  0x35   : > { %162 = vst.msk [vmem:[%s503_s5 + $0x4] sm:$0x1] %vm129_vm0, %v161_v14  ;;  %v169_v17 = vmax.f32 %v166_v15, %v168_v16  ;;  %v174_v18 = vld [vmem:[%s173_s18] sm:$0x1]  ;;  %s183_s28 = scalar_lea.vmem %s497_s7, %s297_s20  ;;  %s422_s7 = smov [#allocation4]  }
  0x36   : > { %v176_v19 = vld [vmem:[%s175_s21] sm:$0x1]  ;;  %p357_p3 = pnand %p356_p2, %p479_p10  ;;  %s359_s26 = sshll.u32 %s422_s7, 4  ;;  %s360_s26 = int_to_ptr.vmem [resolvable:$false] %s359_s26 }
  0x37   : > { %170 = vst.msk [vmem:[%s503_s5 + $0x5] sm:$0x1] %vm129_vm0, %v169_v17  ;;  %v177_v20 = vmax.f32 %v174_v18, %v176_v19  ;;  %v182_v21 = vld [vmem:[%s181_s3] sm:$0x1]  ;;  %s361_s8 = scalar_lea.vmem %s360_s26, 256  ;;  %p362_p5 = scmp.lt.s32.totalorder %s538_s27, %s360_s26 }
  0x38   : > { %v184_v22 = vld [vmem:[%s183_s28] sm:$0x1]  ;;  %p358_p4 = pneg %p357_p3  ;;  %p363_p6 = scmp.lt.s32.totalorder %s361_s8, %s355_s9 }
  0x39   : > { %178 = vst.msk [vmem:[%s503_s5 + $0x6] sm:$0x1] %vm129_vm0, %v177_v20  ;;  %v185_v23 = vmax.f32 %v182_v21, %v184_v22 }
  0x3a   : > { %p364_p7 = por %p363_p6, %p362_p5 }
  0x3b   : > { %186 = vst.msk [vmem:[%s503_s5 + $0x7] sm:$0x1] %vm129_vm0, %v185_v23 }
  0x3c   : > { %p365_p8 = pnand %p364_p7, %p358_p4 }
  0x3e   : > { %368 = shalt.err (!%p365_p8)
}
  0x3f   : > { %s369_s25 = scalar_lea.hbm %s536_s4, 128  ;;  %s373_s10 = scalar_lea.hbm %s584_s2, 256 }
  0x40   : > { %p370_p9 = scmp.ne.s32.totalorder %s536_s4, %s369_s25  ;;  %p374_p0 = scmp.lt.u32.totalorder %s536_s4, %s584_s2 }
  0x41   : > { %p375_p1 = scmp.lt.u32.totalorder %s373_s10, %s369_s25  ;;  %p377_p3 = scmp.lt.u32.totalorder %s369_s25, %s536_s4 }
  0x42   : > { %p371_p12 = pnand %p370_p9, %p479_p10 }
  0x43   : > { %p376_p2 = por %p375_p1, %p374_p0 }
  0x44   : > { %p372_p13 = pneg %p371_p12 }
  0x45   : > { %p378_p4 = por %p377_p3, %p376_p2 }
  0x47   : > { %p379_p5 = pnand %p378_p4, %p372_p13 }
  0x49   : > { %382 = shalt.err (!%p379_p5)
}
  0x4a   : > { %303 = dma.vmem_to_hbm [thread:$0]  (%p479_p10), %s538_s27, 128, %s536_s4, %s188_s17  }
  0x4b PF: > { %p309_p6 = scmp.ge.s32.totalorder %s419_s16, 2  ;;  %s213_s13 = sand.u32 1, %s407_s14  }
  0x4c   : > { %s214_s18 = scalar_lea.sflag [#allocation5], %s213_s13 }
  0x4d   : > { %p306_p7 = pnand %p309_p6, %p483_p11 }
  0x4f   : > { %402 = dma.done.wait (!%p306_p7), %s214_s18, 128  }
  0x50   : > { %404 = vsyncadd (!%p306_p7), %s214_s18, 4294967168  ;;  %p18_p8 = scmp.ge.s32.totalorder %s466_s19, 4   ;;  %s587_s14 = smov %s411_s15 }
  0x51   : > { %s588_s15 = smov %s415_s0  ;;  %s589_s0 = smov %s477_s22 }
  0x52   : > { %s590_s16 = smov %s466_s19  ;;  %20 = sbr.rel (!%p18_p8) target bundleno = 18 (0x12), region = 75 }
  0x59   :  { %219 = vsyncpa [#allocation5], 1 }
  0x5a   :  { %221 = vsyncpa [#allocation5 + $0x1], 1 }

</bundles_post_ra>
